<compile_context>
chip_gen: v5e
topology: v5e:2x2
jax: 0.10.0
libtpu: 0.0.40
codegen_flags: <defaults>
</compile_context>

<pallas_src>
import functools

import jax
import jax.numpy as jnp
import numpy as np
from jax import lax
from jax.experimental import pallas as pl
from jax.experimental.pallas import tpu as pltpu

# Sentinel used to knock already-selected experts out of the running max.
# NOTE: assumes real logits are finite and > -1e30 (NaNs would poison the
# max/equality chain) — true for any sane gating network.
_NEG_INF = -1e30


def topk_gate_kernel(x_ref, w_ref, b_ref, gates_ref, routing_ref, *, top_k):
    """Fused gating linear + top-k + softmax(top-k) + scatter, one token tile.

    x_ref:       (TILE_T, D) tokens (streamed, double-buffered)
    w_ref:       (E, D)      gate weight (resident in VMEM)
    b_ref:       (E, 1)      gate bias (resident)
    gates_ref:   (E, TILE_T) sparse softmax'd gates (transposed output)
    routing_ref: (E, TILE_T) raw routing logits (transposed output)
    """
    x = x_ref[...]
    w = w_ref[...]
    b = b_ref[...].astype(jnp.float32)

    # NT matmul on the MXU: (E, D) x (TILE_T, D) contracting D against D.
    # The result pops already lane-dense as (E, TILE_T) — no XLU transpose,
    # no narrow (TILE_T, E) intermediate.
    routing_t = lax.dot_general(
        w, x,
        dimension_numbers=(((1,), (1,)), ((), ())),
        preferred_element_type=jnp.float32,
    ) + b                                                        # (E, TILE_T)
    routing_ref[...] = routing_t.astype(routing_ref.dtype)

    E, Tt = routing_t.shape
    # f32 expert indices (exact for small ints) — cheap sublane-axis iota.
    expert_idx = lax.broadcasted_iota(jnp.int32, (E, Tt), 0).astype(jnp.float32)

    # Iterative top-k (k small & static): repeatedly take the per-token max
    # over the expert (sublane) axis, build a first-occurrence one-hot, mask.
    # Only a combined "selected" mask and the overall max stay live (low vreg
    # pressure at large TILE_T).  All of this stays in f32.
    masked = routing_t
    selected = None
    vmax = None
    for k in range(top_k):
        v = jnp.max(masked, axis=0, keepdims=True)               # (1, TILE_T)
        is_max = masked == v
        first = jnp.min(jnp.where(is_max, expert_idx, float(E)),
                        axis=0, keepdims=True)                   # (1, TILE_T)
        onehot = expert_idx == first                             # (E, TILE_T)
        if k == 0:
            vmax = v
            selected = onehot
        else:
            selected = jnp.logical_or(selected, onehot)
        if k + 1 < top_k:
            masked = jnp.where(onehot, _NEG_INF, masked)

    # Softmax over the selected logits, scattered in place.  For small E the
    # full-tile exp is hidden under the x DMA; exact reciprocal keeps 1e-5 tol.
    p = jnp.where(selected, jnp.exp(routing_t - vmax), 0.0)      # (E, TILE_T)
    denom = jnp.sum(p, axis=0, keepdims=True)                    # (1, TILE_T)
    gates_t = p * pl.reciprocal(denom)
    gates_ref[...] = gates_t.astype(gates_ref.dtype)


def _vmem_capacity_bytes():
    """Physical VMEM of the current generation; conservative fallback (v7x)."""
    try:
        return int(pltpu.get_tpu_info().vmem_capacity_bytes)
    except Exception:
        return 64 << 20


def _pick_tile_t(num_tokens, d_model, itemsize, vmem_cap):
    """Largest token tile whose double-buffered x stays within ~3/8 of VMEM.

    ~48 MiB on v5e/v6e (128 MiB VMEM), ~24 MiB on v7x (64 MiB per TC) —
    leaves room for the resident weight, both (E, tile_t) outputs and
    compiler headroom while maximizing DMA efficiency of the HBM-bound
    x stream.
    """
    budget = (vmem_cap * 3) // 8
    tile = 2048
    while tile > 128 and 2 * tile * d_model * itemsize > budget:
        tile //= 2
    if num_tokens <= tile:
        return num_tokens   # single full block (block == full dim is legal)
    return tile             # multiple of 128 -> lane-dense output stores


def topk_gate(x, weight, bias, top_k=2, tile_t=None):
    """Wrapper: flatten tokens, tile over them, call the kernel, reshape."""
    *lead, d_model = x.shape
    T = int(np.prod(lead)) if lead else 1
    E = weight.shape[0]

    x2 = x.reshape(T, d_model)          # keep input dtype (no upcast: bf16 ok)
    b2 = bias.reshape(E, 1)             # (E, 1)  broadcasts over token lanes

    itemsize = int(np.dtype(x.dtype).itemsize)
    w_itemsize = int(np.dtype(weight.dtype).itemsize)
    vmem_cap = _vmem_capacity_bytes()

    if tile_t is None:
        tile_t = _pick_tile_t(T, d_model, itemsize, vmem_cap)
    tile_t = min(int(tile_t), T)
    grid = (pl.cdiv(T, tile_t),)

    # Explicit VMEM limit with headroom, capped at 7/8 of the generation's
    # physical VMEM (so a tile sized for v5e/v6e never overshoots v7x).
    need = (2 * tile_t * d_model * itemsize          # double-buffered x
            + 2 * d_model * E * w_itemsize           # resident weight (+bias)
            + 2 * 2 * E * tile_t * itemsize          # two (E, tile_t) outputs
            + (4 << 20))
    vmem_limit = int(min((vmem_cap * 7) // 8, max(32 << 20, 2 * need)))

    # Advisory cost: memory-bound op streaming x once, writing 2*(E,T).
    cost = pl.CostEstimate(
        flops=2 * T * d_model * E,
        transcendentals=E * T,
        bytes_accessed=(T * d_model * itemsize
                        + 2 * E * T * itemsize
                        + d_model * E * w_itemsize),
    )

    kernel = functools.partial(topk_gate_kernel, top_k=top_k)

    gates_t, routing_t = pl.pallas_call(
        kernel,
        out_shape=(
            jax.ShapeDtypeStruct((E, T), x.dtype),
            jax.ShapeDtypeStruct((E, T), x.dtype),
        ),
        grid=grid,
        in_specs=[
            pl.BlockSpec((tile_t, d_model), lambda i: (i, 0)),   # streamed x
            pl.BlockSpec((E, d_model), lambda i: (0, 0)),        # resident W
            pl.BlockSpec((E, 1), lambda i: (0, 0)),              # resident b
        ],
        out_specs=(
            pl.BlockSpec((E, tile_t), lambda i: (0, i)),
            pl.BlockSpec((E, tile_t), lambda i: (0, i)),
        ),
        compiler_params=pltpu.CompilerParams(
            dimension_semantics=("parallel",),   # token tiles are independent
            vmem_limit_bytes=vmem_limit,
        ),
        cost_estimate=cost,
    )(x2, weight, b2)

    # E is tiny here -> these transposes are negligible HBM traffic.
    gates = gates_t.T.reshape(*lead, E)
    routing = routing_t.T.reshape(*lead, E)
    return gates, routing


def _reference(x, weight, bias, top_k=2):
    """Pure-JAX reference mirroring the PyTorch forward."""
    routing = x @ weight.T + bias
    top_vals, top_idx = lax.top_k(routing, top_k)
    sm = jax.nn.softmax(top_vals, axis=-1)
    onehots = jax.nn.one_hot(top_idx, routing.shape[-1], dtype=routing.dtype)
    gates = jnp.einsum("...k,...ke->...e", sm, onehots)
    return gates, routing


if __name__ == "__main__":
    def _check(batch, seq, d_model, num_experts, top_k, tile_t=None, seed=0):
        key = jax.random.PRNGKey(seed)
        kx, kw, kb = jax.random.split(key, 3)
        x = jax.random.normal(kx, (batch, seq, d_model), dtype=jnp.float32)
        weight = jax.random.normal(
            kw, (num_experts, d_model), dtype=jnp.float32) * 0.1
        bias = jax.random.normal(kb, (num_experts,), dtype=jnp.float32) * 0.01

        gates, routing = topk_gate(x, weight, bias, top_k=top_k, tile_t=tile_t)
        gates = jax.block_until_ready(gates)
        routing = jax.block_until_ready(routing)

        g_ref, r_ref = _reference(x, weight, bias, top_k=top_k)
        assert gates.shape == (batch, seq, num_experts)
        assert routing.shape == (batch, seq, num_experts)
        np.testing.assert_allclose(np.asarray(routing), np.asarray(r_ref),
                                   rtol=1e-5, atol=1e-5)
        np.testing.assert_allclose(np.asarray(gates), np.asarray(g_ref),
                                   rtol=1e-5, atol=1e-5)

    # Small shape implied by the module (single full-block path).
    _check(batch=2, seq=8, d_model=32, num_experts=8, top_k=2, seed=0)
    # Larger shape that exercises the tiled / pipelined grid path (grid=2).
    _check(batch=4, seq=64, d_model=128, num_experts=8, top_k=2, tile_t=128,
           seed=1)

    print("KERNEL_OK")
</pallas_src>

<mosaic_0001>
module attributes {stable_mosaic.version = 11 : i64} {
  func.func @topk_gate_kernel(%arg0: i32, %arg1: memref<16x32xf32, #tpu.memory_space<vmem>>, %arg2: memref<8x32xf32, #tpu.memory_space<vmem>>, %arg3: memref<8x1xf32, #tpu.memory_space<vmem>>, %arg4: memref<8x16xf32, #tpu.memory_space<vmem>>, %arg5: memref<8x16xf32, #tpu.memory_space<vmem>>) attributes {dimension_semantics = [#tpu.dimension_semantics<parallel>], iteration_bounds = array<i64: 1>, scalar_prefetch = 0 : i64, scratch_operands = 0 : i64, tpu.core_type = #tpu.core_type<tc>, window_params = [{transform_indices = @transform_0, window_bounds = array<i64: 16, 32>}, {pipeline_mode = #tpu.pipeline_mode<synchronous>, transform_indices = @transform_1, window_bounds = array<i64: 8, 32>}, {pipeline_mode = #tpu.pipeline_mode<synchronous>, transform_indices = @transform_2, window_bounds = array<i64: 8, 1>}, {transform_indices = @transform_3, window_bounds = array<i64: 8, 16>}, {transform_indices = @transform_4, window_bounds = array<i64: 8, 16>}]} {
    %c0 = arith.constant 0 : index
    %c0_0 = arith.constant 0 : index
    %0 = vector.load %arg1[%c0, %c0_0] : memref<16x32xf32, #tpu.memory_space<vmem>>, vector<16x32xf32>
    %c0_1 = arith.constant 0 : index
    %c0_2 = arith.constant 0 : index
    %1 = vector.load %arg2[%c0_1, %c0_2] : memref<8x32xf32, #tpu.memory_space<vmem>>, vector<8x32xf32>
    %c0_3 = arith.constant 0 : index
    %c0_4 = arith.constant 0 : index
    %2 = vector.load %arg3[%c0_3, %c0_4] : memref<8x1xf32, #tpu.memory_space<vmem>>, vector<8x1xf32>
    %cst = arith.constant dense<0.000000e+00> : vector<8x16xf32>
    %3 = tpu.matmul %1, %0, %cst {dimension_numbers = #tpu.dot_dimension_numbers<[1], [1], [0], [0], [0, 0, 1, 0], [], []>} : vector<8x32xf32>, vector<16x32xf32>, vector<8x16xf32> -> vector<8x16xf32>
    %4 = vector.broadcast %2 : vector<8x1xf32> to vector<8x16xf32>
    %5 = arith.addf %3, %4 : vector<8x16xf32>
    %c0_5 = arith.constant 0 : index
    %c0_6 = arith.constant 0 : index
    %6 = vector.load %arg5[%c0_5, %c0_6] : memref<8x16xf32, #tpu.memory_space<vmem>>, vector<8x16xf32>
    tpu.vector_store %arg5[%c0_5, %c0_6], %5 {strides = array<i32>} : memref<8x16xf32, #tpu.memory_space<vmem>>, vector<8x16xf32>,
    %7 = tpu.iota {dimensions = array<i32: 0>} : vector<8x16xi32>
    %8 = arith.sitofp %7 : vector<8x16xi32> to vector<8x16xf32>
    %cst_7 = arith.constant dense<0xFF800000> : vector<16xf32>
    %9 = vector.multi_reduction <maximumf>, %5, %cst_7 [0] : vector<8x16xf32> to vector<16xf32>
    %10 = vector.shape_cast %9 : vector<16xf32> to vector<1x16xf32>
    %11 = vector.broadcast %10 : vector<1x16xf32> to vector<8x16xf32>
    %12 = arith.cmpf oeq, %5, %11 : vector<8x16xf32>
    %cst_8 = arith.constant 8.000000e+00 : f32
    %13 = vector.broadcast %cst_8 : f32 to vector<8x16xf32>
    %14 = arith.select %12, %8, %13 : vector<8x16xi1>, vector<8x16xf32>
    %cst_9 = arith.constant dense<0x7F800000> : vector<16xf32>
    %15 = vector.multi_reduction <minimumf>, %14, %cst_9 [0] : vector<8x16xf32> to vector<16xf32>
    %16 = vector.shape_cast %15 : vector<16xf32> to vector<1x16xf32>
    %17 = vector.broadcast %16 : vector<1x16xf32> to vector<8x16xf32>
    %18 = arith.cmpf oeq, %8, %17 : vector<8x16xf32>
    %cst_10 = arith.constant -1.000000e+30 : f32
    %19 = vector.broadcast %cst_10 : f32 to vector<8x16xf32>
    %20 = arith.select %18, %19, %5 : vector<8x16xi1>, vector<8x16xf32>
    %cst_11 = arith.constant dense<0xFF800000> : vector<16xf32>
    %21 = vector.multi_reduction <maximumf>, %20, %cst_11 [0] : vector<8x16xf32> to vector<16xf32>
    %22 = vector.shape_cast %21 : vector<16xf32> to vector<1x16xf32>
    %23 = vector.broadcast %22 : vector<1x16xf32> to vector<8x16xf32>
    %24 = arith.cmpf oeq, %20, %23 : vector<8x16xf32>
    %cst_12 = arith.constant 8.000000e+00 : f32
    %25 = vector.broadcast %cst_12 : f32 to vector<8x16xf32>
    %26 = arith.select %24, %8, %25 : vector<8x16xi1>, vector<8x16xf32>
    %cst_13 = arith.constant dense<0x7F800000> : vector<16xf32>
    %27 = vector.multi_reduction <minimumf>, %26, %cst_13 [0] : vector<8x16xf32> to vector<16xf32>
    %28 = vector.shape_cast %27 : vector<16xf32> to vector<1x16xf32>
    %29 = vector.broadcast %28 : vector<1x16xf32> to vector<8x16xf32>
    %30 = arith.cmpf oeq, %8, %29 : vector<8x16xf32>
    %31 = arith.ori %18, %30 : vector<8x16xi1>
    %32 = vector.broadcast %10 : vector<1x16xf32> to vector<8x16xf32>
    %33 = arith.subf %5, %32 : vector<8x16xf32>
    %34 = math.exp %33 : vector<8x16xf32>
    %cst_14 = arith.constant 0.000000e+00 : f32
    %35 = vector.broadcast %cst_14 : f32 to vector<8x16xf32>
    %36 = arith.select %31, %34, %35 : vector<8x16xi1>, vector<8x16xf32>
    %cst_15 = arith.constant dense<0.000000e+00> : vector<16xf32>
    %37 = vector.multi_reduction <add>, %36, %cst_15 [0] : vector<8x16xf32> to vector<16xf32>
    %38 = vector.shape_cast %37 : vector<16xf32> to vector<1x16xf32>
    %39 = tpu.reciprocal %38 : vector<1x16xf32> -> vector<1x16xf32>
    %40 = vector.broadcast %39 : vector<1x16xf32> to vector<8x16xf32>
    %41 = arith.mulf %36, %40 : vector<8x16xf32>
    %c0_16 = arith.constant 0 : index
    %c0_17 = arith.constant 0 : index
    %42 = vector.load %arg4[%c0_16, %c0_17] : memref<8x16xf32, #tpu.memory_space<vmem>>, vector<8x16xf32>
    tpu.vector_store %arg4[%c0_16, %c0_17], %41 {strides = array<i32>} : memref<8x16xf32, #tpu.memory_space<vmem>>, vector<8x16xf32>,
    return
  }
  func.func @transform_0(%arg0: i32) -> (i32, i32) {
    %c0_i32 = arith.constant 0 : i32
    %c0_i32_0 = arith.constant 0 : i32
    return %arg0, %c0_i32 : i32, i32
  }
  func.func @transform_1(%arg0: i32) -> (i32, i32) {
    %c0_i32 = arith.constant 0 : i32
    %c0_i32_0 = arith.constant 0 : i32
    %c0_i32_1 = arith.constant 0 : i32
    return %c0_i32, %c0_i32_0 : i32, i32
  }
  func.func @transform_2(%arg0: i32) -> (i32, i32) {
    %c0_i32 = arith.constant 0 : i32
    %c0_i32_0 = arith.constant 0 : i32
    %c0_i32_1 = arith.constant 0 : i32
    return %c0_i32, %c0_i32_0 : i32, i32
  }
  func.func @transform_3(%arg0: i32) -> (i32, i32) {
    %c0_i32 = arith.constant 0 : i32
    %c0_i32_0 = arith.constant 0 : i32
    return %c0_i32, %arg0 : i32, i32
  }
  func.func @transform_4(%arg0: i32) -> (i32, i32) {
    %c0_i32 = arith.constant 0 : i32
    %c0_i32_0 = arith.constant 0 : i32
    return %c0_i32, %arg0 : i32, i32
  }
}

</mosaic_0001>

<bundles_post_ra>
// kernel: tpu_custom_call.1
= control target key start
LH: loop header
LB: loop body
LE: loop exit
PB: predicated region body
PF: predicated region fallthrough
CT: control target
= control target key end

     0   :  { %10 = vsyncpa [#allocation3], 0  ;;  %s321_s0 = inlined_call_operand.hbm [shape: f32[16,32], index: 0, kind: input, shape index: {}]   ;;  %s322_s1 = inlined_call_operand.vmem [shape: f32[8,32], index: 1, kind: input, shape index: {}]   ;;  %s323_s2 = inlined_call_operand.vmem [shape: f32[8,1], index: 2, kind: input, shape index: {}]   ;;  %s324_s3 = inlined_call_operand.hbm [shape: f32[8,16], index: 3, kind: output, shape index: {0}]   ;;  %s325_s4 = inlined_call_operand.hbm [shape: f32[8,16], index: 4, kind: output, shape index: {1}]  }
   0x1   :  { %11 = vsyncpa [#allocation4], 0 }
   0x2   :  { %12 = vsyncpa [#allocation7], 0  ;;  %s17_s17 = sshll.u32 %s321_s0, 4  ;;  %s266_s18 = smov [#allocation2]   ;;  %s18_s17 = int_to_ptr.hbm [resolvable:$true] %s17_s17 }
   0x3   :  { %s19_s19 = sshll.u32 %s266_s18, 4  ;;  %s267_s20 = smov 128   ;;  %s20_s19 = int_to_ptr.vmem [resolvable:$true] %s19_s19 }
   0x4   :  { %s268_s21 = smov 8  }
   0x5   :  { %25 = dma.hbm_to_vmem [thread:$0]  %s18_s17, 256, %s20_s19, [#allocation3], %s267_s20, %s267_s20, %s268_s21  }
   0x6   :  { %260 = dma.done.wait [#allocation3], 256  }
   0x7   :  { %261 = vsyncadd [#allocation3], 4294967040  ;;  %v269_v0 = vmov 0   ;;  %vm43_vm0 = vcmask 261120   ;;  %v35_v1 = vld [vmem:[#allocation2 + $0x8] sm:$0xff]  ;;  %v37_v2 = vld [vmem:[%s323_s2] sm:$0xff]  ;;  %v75_v10 = vlaneseq }
   0x8   :  { %183 = vset.pattern.permute.xlu0 %v269_v0  ;;  %174 = vmatpush.xpose.msk.msra.mxu0 %vm43_vm0, %v35_v1  ;;  %v34_v3 = vld [vmem:[#allocation2] sm:$0xff]  ;;  %s270_s25 = smov [#allocation6]   ;;  %s159_s29 = sshll.u32 %s325_s4, 4  ;;  %vm73_vm1 = vcmask 130048   ;;  %s160_s29 = int_to_ptr.hbm [resolvable:$true] %s159_s29 }
   0x9   :  { %40 = vperm.xlu0 %183, %v37_v2   ;;  %v36_v4 = vld [vmem:[%s322_s1] sm:$0xff]  ;;  %s157_s26 = sshll.u32 %s270_s25, 4  ;;  %v76_v13 = vshrl.u32 %v75_v10, 7  ;;  %s271_s1 = smov [#allocation5]   ;;  %s158_s26 = int_to_ptr.vmem [resolvable:$true] %s157_s26 }
   0xa   :  { %s146_s2 = sshll.u32 %s271_s1, 4  ;;  %s148_s5 = sshll.u32 %s324_s3, 4  ;;  %s147_s2 = int_to_ptr.vmem [resolvable:$true] %s146_s2  ;;  %s149_s5 = int_to_ptr.hbm [resolvable:$true] %s148_s5 }
   0xb   :  { %v77_v16 = vcvt.s32.f32 %v76_v13 }
   0xc   :  { %175 = vmatpush.xpose.msk.msra.mxu0 %vm43_vm0, %v34_v3 }
   0xf   :  { %176 = vmatmul.msk.f32.vlgmr.msra.gmra.mxu0 %vm43_vm0, %v36_v4 }
  0x7b   :  { %v41_v5 = vpop.permute.xlu0 %40 }
  0x8c   :  { %v70_v6 = vpop.f32.mrf.mxu0 }
  0x8d   :  { %v71_v7 = vadd.f32 %v70_v6, %v41_v5 }
  0x8f   :  { %v78_v8 = vsel %vm73_vm1, %v71_v7, -inf  ;;  %74 = vst.msk [vmem:[#allocation6] sm:$0xff] %vm73_vm1, %v71_v7 }
  0x90   :  { %v79_v9 = vrot.slane %v78_v8, 4  ;;  %162 = dma.vmem_to_hbm [thread:$0]  %s158_s26, 128, %s160_s29, [#allocation7]  }
  0x92   :  { %v80_v11 = vmax.f32 %v78_v8, %v79_v9 }
  0x94   :  { %v81_v12 = vrot.slane %v80_v11, 2 }
  0x96   :  { %v82_v14 = vmax.f32 %v80_v11, %v81_v12 }
  0x98   :  { %v83_v15 = vrot.slane %v82_v14, 1 }
  0x9a   :  { %v84_v17 = vmax.f32 %v82_v14, %v83_v15 }
  0x9c   :  { %vm85_vm2 = vcmp.eq.f32.partialorder %v71_v7, %v84_v17  ;;  %v114_v35 = vsub.f32 %v71_v7, %v84_v17 }
  0x9d   :  { %v86_v18 = vsel %vm85_vm2, %v77_v16, 8.0 }
  0x9e   :  { %v87_v19 = vsel %vm73_vm1, %v86_v18, inf  ;;  %v115_v39 = vmul.f32 1.442695, %v114_v35 }
  0x9f   :  { %v88_v20 = vrot.slane %v87_v19, 4 }
  0xa0   :  { %184 = vpow2.f32 %v115_v39 }
  0xa1   :  { %v89_v21 = vmin.f32 %v87_v19, %v88_v20 }
  0xa3   :  { %v90_v22 = vrot.slane %v89_v21, 2 }
  0xa5   :  { %v91_v23 = vmin.f32 %v89_v21, %v90_v22 }
  0xa6   :  { %v185_v44 = vpop.eup %184 }
  0xa7   :  { %v92_v24 = vrot.slane %v91_v23, 1 }
  0xa9   :  { %v93_v25 = vmin.f32 %v91_v23, %v92_v24 }
  0xab   :  { %vm94_vm3 = vcmp.eq.f32.partialorder %v77_v16, %v93_v25 }
  0xac   :  { %v95_v26 = vsel %vm94_vm3, -1e+30, %v71_v7 }
  0xad   :  { %v96_v27 = vsel %vm73_vm1, %v95_v26, -inf }
  0xae   :  { %v97_v28 = vrot.slane %v96_v27, 4 }
  0xb0   :  { %v98_v29 = vmax.f32 %v96_v27, %v97_v28 }
  0xb2   :  { %v99_v30 = vrot.slane %v98_v29, 2 }
  0xb4   :  { %v100_v31 = vmax.f32 %v98_v29, %v99_v30 }
  0xb6   :  { %v101_v32 = vrot.slane %v100_v31, 1 }
  0xb8   :  { %v102_v33 = vmax.f32 %v100_v31, %v101_v32 }
  0xba   :  { %vm103_vm4 = vcmp.eq.f32.partialorder %v95_v26, %v102_v33 }
  0xbb   :  { %v104_v34 = vsel %vm103_vm4, %v77_v16, 8.0 }
  0xbc   :  { %v105_v36 = vsel %vm73_vm1, %v104_v34, inf }
  0xbd   :  { %v106_v37 = vrot.slane %v105_v36, 4 }
  0xbf   :  { %v107_v38 = vmin.f32 %v105_v36, %v106_v37 }
  0xc1   :  { %v108_v40 = vrot.slane %v107_v38, 2 }
  0xc3   :  { %v109_v41 = vmin.f32 %v107_v38, %v108_v40 }
  0xc5   :  { %v110_v42 = vrot.slane %v109_v41, 1 }
  0xc7   :  { %v111_v43 = vmin.f32 %v109_v41, %v110_v42 }
  0xc9   :  { %vm112_vm5 = vcmp.eq.f32.partialorder %v77_v16, %v111_v43 }
  0xca   :  { %vm113_vm6 = vmor %vm94_vm3, %vm112_vm5 }
  0xcb   :  { %v117_v45 = vsel %vm113_vm6, %v185_v44, 0.0 }
  0xcc   :  { %v118_v46 = vsel %vm73_vm1, %v117_v45, 0.0 }
  0xcd   :  { %v119_v47 = vrot.slane %v118_v46, 4 }
  0xcf   :  { %v120_v48 = vadd.f32 %v119_v47, %v118_v46 }
  0xd1   :  { %v121_v49 = vrot.slane %v120_v48, 2 }
  0xd3   :  { %v122_v50 = vadd.f32 %v121_v49, %v120_v48 }
  0xd5   :  { %v123_v51 = vrot.slane %v122_v50, 1 }
  0xd7   :  { %v124_v52 = vadd.f32 %v123_v51, %v122_v50 }
  0xd9   :  { %186 = vrcp.f32 %v124_v52  ;;  %v136_v56 = vand.u32 2147483648, %v124_v52  ;;  %v134_v58 = vand.u32 2147483647, %v124_v52  ;;  %vm130_vm8 = vweird.f32 %v124_v52 }
  0xdb   :  { %v137_v60 = vor.u32 1.1754944e-38, %v136_v56  ;;  %vm135_vm10 = vcmp.eq.f32.partialorder %v134_v58, 8.507059e+37 }
  0xdf   :  { %v187_v53 = vpop.eup %186 }
  0xe0   :  { %v126_v54 = vmul.f32 %v187_v53, %v124_v52  ;;  %vm131_vm7 = vweird.f32 %v187_v53 }
  0xe1   :  { %vm132_vm9 = vmor %vm130_vm8, %vm131_vm7 }
  0xe2   :  { %v127_v55 = vsub.f32 1.0, %v126_v54 }
  0xe4   :  { %v128_v57 = vmul.f32 %v187_v53, %v127_v55 }
  0xe6   :  { %v129_v59 = vadd.f32 %v187_v53, %v128_v57 }
  0xe8   :  { %v133_v61 = vsel %vm132_vm9, %v187_v53, %v129_v59 }
  0xe9   :  { %v138_v62 = vsel %vm135_vm10, %v137_v60, %v133_v61 }
  0xea   :  { %v139_v63 = vmul.f32 %v138_v62, %v117_v45 }
  0xec   :  { %140 = vst.msk [vmem:[#allocation5] sm:$0xff] %vm73_vm1, %v139_v63 }
  0xed   :  { %151 = dma.vmem_to_hbm [thread:$0]  %s147_s2, 128, %s149_s5, [#allocation4]  }
  0xee   :  { %262 = dma.done.wait [#allocation4], 128  }
  0xef   :  { %263 = vsyncadd [#allocation4], 4294967168 }
  0xf0   :  { %264 = dma.done.wait [#allocation7], 128  }
  0xf1   :  { %265 = vsyncadd [#allocation7], 4294967168 }
  0xf2   :  { %171 = vsyncpa [#allocation3], 1 }
  0xf3   :  { %172 = vsyncpa [#allocation4], 1 }
  0xf4   :  { %173 = vsyncpa [#allocation7], 1 }

</bundles_post_ra>
